<compile_context>
chip_gen: v7x
topology: tpu7x:2x2x1
jax: 0.10.0
libtpu: 0.0.40
codegen_flags: <defaults>
</compile_context>

<pallas_src>
import jax
import jax.numpy as jnp
from jax.experimental import pallas as pl
from jax.experimental.pallas import tpu as pltpu


def _relevance_copy_kernel(r_hbm_ref, out_hbm_ref, copy_sem):
    # LRP through ReLU: relevance passes unchanged. One full-array DMA,
    # HBM -> HBM, no VMEM staging, no compute.
    copy = pltpu.make_async_copy(r_hbm_ref, out_hbm_ref, copy_sem)
    copy.start()
    copy.wait()


def relevance_propagation_relu(
    a: jax.Array, r: jax.Array, *, materialize: bool = True
) -> jax.Array:
    """Pallas equivalent of RelevancePropagationReLU.forward(a, r).

    `a` is accepted for signature fidelity but never touched (and never
    DMA'd), matching the reference implementation.

    materialize=False returns `r` directly (the zero-cost identity the op
    actually is). materialize=True (default) produces a fresh output buffer
    via a single HBM->HBM DMA issued from a Pallas kernel.
    """
    del a  # unused, exactly as in the PyTorch module

    if not materialize or r.size == 0:
        # Pure identity: no kernel, no HBM traffic.
        return r

    return pl.pallas_call(
        _relevance_copy_kernel,
        out_shape=jax.ShapeDtypeStruct(r.shape, r.dtype),
        # Leave both operands in HBM; the kernel drives the copy with one DMA.
        in_specs=[pl.BlockSpec(memory_space=pl.ANY)],
        out_specs=pl.BlockSpec(memory_space=pl.ANY),
        scratch_shapes=[pltpu.SemaphoreType.DMA],
    )(r)


if __name__ == "__main__":
    key = jax.random.PRNGKey(0)
    k_a, k_r = jax.random.split(key)

    # Small NCHW shapes consistent with a conv-net activation / relevance pair.
    shape = (2, 4, 16, 16)
    a = jax.random.normal(k_a, shape, dtype=jnp.float32)
    r = jax.random.normal(k_r, shape, dtype=jnp.float32)

    out = relevance_propagation_relu(a, r)
    out = jax.block_until_ready(out)

    # Forward semantics: output is exactly r (bit-exact).
    assert out.shape == r.shape
    assert out.dtype == r.dtype
    assert bool(jnp.array_equal(out, r))

    # Zero-cost path is also the identity.
    out2 = relevance_propagation_relu(a, r, materialize=False)
    assert bool(jnp.array_equal(jax.block_until_ready(out2), r))

    print("KERNEL_OK")
</pallas_src>

<mosaic_0001>
module attributes {stable_mosaic.version = 11 : i64} {
  func.func @_relevance_copy_kernel(%arg0: memref<2x4x16x16xf32, #tpu.memory_space<any>>, %arg1: memref<2x4x16x16xf32, #tpu.memory_space<any>>, %arg2: memref<!tpu.dma_semaphore, #tpu.memory_space<semaphore_mem>>) attributes {dimension_semantics = [], scalar_prefetch = 0 : i64, scratch_operands = 1 : i64, tpu.core_type = #tpu.core_type<tc>} {
    tpu.enqueue_dma source(%arg0 : memref<2x4x16x16xf32, #tpu.memory_space<any>>) target(%arg1 : memref<2x4x16x16xf32, #tpu.memory_space<any>>) target_semaphore(%arg2 : memref<!tpu.dma_semaphore, #tpu.memory_space<semaphore_mem>>)
    tpu.wait_dma2 semaphore(%arg2 : memref<!tpu.dma_semaphore, #tpu.memory_space<semaphore_mem>>) src(%arg0 : memref<2x4x16x16xf32, #tpu.memory_space<any>>) dst(%arg1 : memref<2x4x16x16xf32, #tpu.memory_space<any>>)
    return
  }
}

</mosaic_0001>

<bundles_post_ra>
// kernel: tpu_custom_call.1
= control target key start
LH: loop header
LB: loop body
LE: loop exit
PB: predicated region body
PF: predicated region fallthrough
CT: control target
= control target key end

     0   :  { %s36_s6 = smov [#allocation2]   ;;  %s37_s7 = smov [#allocation3]   ;;  %s55_s0 = inlined_call_operand.hbm [shape: f32[2,4,16,16], index: 0, kind: input, shape index: {}]   ;;  %s56_s1 = inlined_call_operand.hbm [shape: f32[2,4,16,16], index: 1, kind: output, shape index: {}]  }
   0x1   :  { %s38_s8 = smov 0  }
   0x2   :  { %18 = dma.general %s55_s0, 2048, %s56_s1, %s36_s6, %s37_s7, [#allocation4], %s38_s8, 0  }
   0x3   :  { %34 = dma.done.wait [#allocation2], 2048 }
   0x4   :  { %35 = vsyncadd [#allocation2], 4294965248 }
   0x5   :  { %24 = vsyncmov [#allocation2] }
   0x8   :  { %s25_s13 = vpop.sfrf %24 }
   0x9   :  { %p30_p0 = scmp.ne.s32.totalorder %s25_s13, 0 }
   0xb   :  { %29 = shalt.err (%p30_p0)  }

</bundles_post_ra>
